<compile_context>
chip_gen: v7x
topology: tpu7x:2x2x1
jax: 0.10.0
libtpu: 0.0.40
codegen_flags: <defaults>
</compile_context>

<pallas_src>
import functools

import jax
import jax.numpy as jnp
from jax.experimental import pallas as pl
from jax.experimental.pallas import tpu as pltpu


def _rmsnorm_kernel(x_ref, w_ref, o_ref, *, eps, inv_h):
    # x_ref: (tm, H) tile of token rows; w_ref: (1, H) weight; o_ref: (tm, H).
    x = x_ref[...].astype(jnp.float32)                       # .to(torch.float32)
    # mean(-1) as sum * (1/H) with a Python-constant reciprocal (folds to vmul).
    variance = jnp.sum(x * x, axis=-1, keepdims=True) * inv_h
    normed = x * jax.lax.rsqrt(variance + eps)                # x * rsqrt(var + eps)
    # Cast back to input dtype, then multiply by weight (torch semantics).
    normed_in = normed.astype(x_ref.dtype)
    o_ref[...] = (w_ref[...] * normed_in).astype(o_ref.dtype)


def _choose_block_rows(n_rows, hidden, itemsize,
                       target_tile_bytes=4 * 1024 * 1024, max_rows=1024):
    """Pick the number of token rows per tile.

    ~4 MiB of input per tile keeps DMAs large (near HBM roofline) while the
    double-buffered working set stays well under VMEM on v5e/v6e/v7x.
    """
    rows = target_tile_bytes // max(1, hidden * itemsize)
    rows = int(max(8, min(max_rows, rows)))
    # Sublane alignment: multiple of 8 (f32), multiple of 16 for packed dtypes.
    step = 16 if itemsize < 4 else 8
    rows = max(step, (rows // step) * step)
    if n_rows <= rows:
        # Single tile covering all rows; block equal to the full dim is legal.
        return n_rows
    return rows


def rmsnorm(hidden_states, weight, eps=1e-6, *, block_rows=None):
    """RMSNorm forward. hidden_states: (..., H); weight: (H,)."""
    orig_shape = hidden_states.shape
    H = orig_shape[-1]
    x2d = hidden_states.reshape(-1, H)
    n_rows = x2d.shape[0]

    x_itemsize = jnp.dtype(hidden_states.dtype).itemsize
    if block_rows is None:
        block_rows = _choose_block_rows(n_rows, H, x_itemsize)
    block_rows = min(block_rows, n_rows)

    w2d = weight.reshape(1, H)

    # Output dtype follows promotion of weight * x.astype(input_dtype),
    # mirroring `self.weight * hidden_states.to(input_dtype)` in torch.
    out_dtype = jnp.promote_types(weight.dtype, hidden_states.dtype)
    out_itemsize = jnp.dtype(out_dtype).itemsize

    # No host-side padding: ragged last block is masked by Pallas and each
    # row's reduction only touches its own (in-bounds) hidden axis.
    grid = (pl.cdiv(n_rows, block_rows),)

    # VMEM budget: double-buffered input + output tiles, f32 intermediates,
    # plus headroom. Capped at 64 MiB so it also fits v7x (64 MiB physical).
    tile_in = block_rows * H * x_itemsize
    tile_out = block_rows * H * out_itemsize
    tile_f32 = block_rows * H * 4
    vmem_limit = 2 * (tile_in + tile_out) + 2 * tile_f32 + (4 << 20)
    vmem_limit = int(min(max(vmem_limit, 32 << 20), 64 << 20))

    out = pl.pallas_call(
        functools.partial(_rmsnorm_kernel, eps=eps, inv_h=1.0 / H),
        out_shape=jax.ShapeDtypeStruct((n_rows, H), out_dtype),
        grid_spec=pltpu.PrefetchScalarGridSpec(
            num_scalar_prefetch=0,
            grid=grid,
            in_specs=[
                pl.BlockSpec((block_rows, H), lambda i: (i, 0)),
                # Constant block index -> weight stays resident in VMEM.
                pl.BlockSpec((1, H), lambda i: (0, 0)),
            ],
            out_specs=pl.BlockSpec((block_rows, H), lambda i: (i, 0)),
        ),
        compiler_params=pltpu.CompilerParams(
            dimension_semantics=("parallel",),
            vmem_limit_bytes=vmem_limit,
        ),
    )(x2d, w2d)

    return out.reshape(orig_shape[:-1] + (H,))


def rmsnorm_reference(hidden_states, weight, eps=1e-6):
    input_dtype = hidden_states.dtype
    x = hidden_states.astype(jnp.float32)
    variance = jnp.mean(x * x, axis=-1, keepdims=True)
    x = x * jax.lax.rsqrt(variance + eps)
    return weight * x.astype(input_dtype)


if __name__ == "__main__":
    key = jax.random.PRNGKey(0)
    batch, seq, hidden = 2, 8, 32  # NOTE: real models use H % 128 == 0 (lane-dense stores)

    # params_dtype / input dtype: bfloat16 (typical Megatron config).
    x = jax.random.normal(key, (batch, seq, hidden), dtype=jnp.float32).astype(jnp.bfloat16)
    # Module initializes weight = ones(hidden_size, dtype=params_dtype).
    weight = jnp.ones((hidden,), dtype=jnp.bfloat16)

    out = rmsnorm(x, weight, eps=1e-6)
    out = jax.block_until_ready(out)

    ref = rmsnorm_reference(x, weight, eps=1e-6)
    assert out.shape == ref.shape, (out.shape, ref.shape)
    assert out.dtype == ref.dtype, (out.dtype, ref.dtype)
    err = jnp.max(jnp.abs(out.astype(jnp.float32) - ref.astype(jnp.float32)))
    assert float(err) < 2e-2, f"max abs err {float(err)}"

    # Exercise the ragged-tail (non-divisible grid) path with a forced small tile.
    x_big = jax.random.normal(jax.random.PRNGKey(1), (5, 19, hidden),
                              dtype=jnp.float32).astype(jnp.bfloat16)
    out_big = jax.block_until_ready(rmsnorm(x_big, weight, eps=1e-6, block_rows=16))
    ref_big = rmsnorm_reference(x_big, weight, eps=1e-6)
    err_big = jnp.max(jnp.abs(out_big.astype(jnp.float32) - ref_big.astype(jnp.float32)))
    assert float(err_big) < 2e-2, f"max abs err (ragged) {float(err_big)}"

    print("KERNEL_OK")
</pallas_src>

<mosaic_0001>
module attributes {stable_mosaic.version = 11 : i64} {
  func.func @_rmsnorm_kernel(%arg0: i32, %arg1: memref<16x32xbf16, #tpu.memory_space<vmem>>, %arg2: memref<1x32xbf16, #tpu.memory_space<vmem>>, %arg3: memref<16x32xbf16, #tpu.memory_space<vmem>>) attributes {dimension_semantics = [#tpu.dimension_semantics<parallel>], iteration_bounds = array<i64: 1>, scalar_prefetch = 0 : i64, scratch_operands = 0 : i64, tpu.core_type = #tpu.core_type<tc>, window_params = [{transform_indices = @transform_0, window_bounds = array<i64: 16, 32>}, {pipeline_mode = #tpu.pipeline_mode<synchronous>, transform_indices = @transform_1, window_bounds = array<i64: 1, 32>}, {transform_indices = @transform_2, window_bounds = array<i64: 16, 32>}]} {
    %c0 = arith.constant 0 : index
    %c0_0 = arith.constant 0 : index
    %0 = vector.load %arg1[%c0, %c0_0] : memref<16x32xbf16, #tpu.memory_space<vmem>>, vector<16x32xbf16>
    %1 = arith.extf %0 : vector<16x32xbf16> to vector<16x32xf32>
    %2 = arith.mulf %1, %1 : vector<16x32xf32>
    %cst = arith.constant dense<0.000000e+00> : vector<16xf32>
    %3 = vector.multi_reduction <add>, %2, %cst [1] : vector<16x32xf32> to vector<16xf32>
    %4 = vector.shape_cast %3 : vector<16xf32> to vector<16x1xf32>
    %cst_1 = arith.constant 3.125000e-02 : f32
    %5 = vector.broadcast %cst_1 : f32 to vector<16x1xf32>
    %6 = arith.mulf %4, %5 : vector<16x1xf32>
    %cst_2 = arith.constant 9.99999997E-7 : f32
    %7 = vector.broadcast %cst_2 : f32 to vector<16x1xf32>
    %8 = arith.addf %6, %7 : vector<16x1xf32>
    %9 = math.rsqrt %8 : vector<16x1xf32>
    %10 = vector.broadcast %9 : vector<16x1xf32> to vector<16x32xf32>
    %11 = arith.mulf %1, %10 : vector<16x32xf32>
    %12 = arith.truncf %11 : vector<16x32xf32> to vector<16x32xbf16>
    %c0_3 = arith.constant 0 : index
    %c0_4 = arith.constant 0 : index
    %13 = vector.load %arg2[%c0_3, %c0_4] : memref<1x32xbf16, #tpu.memory_space<vmem>>, vector<1x32xbf16>
    %14 = vector.broadcast %13 : vector<1x32xbf16> to vector<16x32xbf16>
    %15 = arith.mulf %14, %12 : vector<16x32xbf16>
    %c0_5 = arith.constant 0 : index
    %c0_6 = arith.constant 0 : index
    %16 = vector.load %arg3[%c0_5, %c0_6] : memref<16x32xbf16, #tpu.memory_space<vmem>>, vector<16x32xbf16>
    tpu.vector_store %arg3[%c0_5, %c0_6], %15 {strides = array<i32>} : memref<16x32xbf16, #tpu.memory_space<vmem>>, vector<16x32xbf16>,
    return
  }
  func.func @transform_0(%arg0: i32) -> (i32, i32) {
    %c0_i32 = arith.constant 0 : i32
    %c0_i32_0 = arith.constant 0 : i32
    return %arg0, %c0_i32 : i32, i32
  }
  func.func @transform_1(%arg0: i32) -> (i32, i32) {
    %c0_i32 = arith.constant 0 : i32
    %c0_i32_0 = arith.constant 0 : i32
    %c0_i32_1 = arith.constant 0 : i32
    return %c0_i32, %c0_i32_0 : i32, i32
  }
  func.func @transform_2(%arg0: i32) -> (i32, i32) {
    %c0_i32 = arith.constant 0 : i32
    %c0_i32_0 = arith.constant 0 : i32
    return %arg0, %c0_i32 : i32, i32
  }
}

</mosaic_0001>

<bundles_post_ra>
// kernel: tpu_custom_call.1
= control target key start
LH: loop header
LB: loop body
LE: loop exit
PB: predicated region body
PF: predicated region fallthrough
CT: control target
= control target key end

     0   :  { %7 = vsyncpa [#allocation3], 0  ;;  %s198_s0 = inlined_call_operand.hbm [shape: bf16[16,32], index: 0, kind: input, shape index: {}]   ;;  %s199_s1 = inlined_call_operand.vmem [shape: bf16[1,32], index: 1, kind: input, shape index: {}]   ;;  %s200_s2 = inlined_call_operand.hbm [shape: bf16[16,32], index: 2, kind: output, shape index: {}]  }
   0x1   :  { %8 = vsyncpa [#allocation4], 0  ;;  %s146_s9 = smov [#allocation2]   ;;  %s98_s13 = scalar_lea.hbm %s198_s0, 128 }
   0x2   :  { %s14_s10 = sshll.u32 %s146_s9, 4  ;;  %p99_p0 = scmp.ne.s32.totalorder %s198_s0, %s98_s13  ;;  %s15_s10 = int_to_ptr.vmem [resolvable:$true] %s14_s10 }
   0x3   :  { %p102_p1 = scmp.lt.u32.totalorder %s98_s13, %s198_s0 }
   0x5   :  { %p104_p2 = pnand %p102_p1, %p99_p0 }
   0x7   :  { %107 = shalt.err (!%p104_p2)
}
   0x8   :  { %s108_s18 = scalar_lea.vmem %s15_s10, 128  ;;  %p113_p4 = scmp.lt.s32.totalorder %s15_s10, %s15_s10 }
   0x9   :  { %p109_p3 = scmp.ne.s32.totalorder %s15_s10, %s108_s18  ;;  %p114_p5 = scmp.lt.s32.totalorder %s108_s18, %s108_s18 }
   0xb   :  { %p115_p6 = por %p114_p5, %p113_p4 }
   0xd   :  { %p116_p7 = pnand %p115_p6, %p109_p3 }
   0xf   :  { %119 = shalt.err (!%p116_p7)
}
  0x10   :  { %s147_s19 = smov 64   ;;  %s148_s20 = smov 4  }
  0x11   :  { %20 = dma.hbm_to_vmem [thread:$0]  %s198_s0, 128, %s15_s10, [#allocation3], %s147_s19, %s147_s19, %s148_s20  }
  0x12   :  { %142 = dma.done.wait [#allocation3], 128  }
  0x13   :  { %143 = vsyncadd [#allocation3], 4294967168  ;;  %v87_v0 = vld [vmem:[#allocation2] sm:$0xff]   ;;  %vm32_vm0 = vcmask 261120   ;;  %v52_v13 = vlaneseq  ;;  %s149_s24 = smov [#allocation5]   ;;  %vm64_vm1 = vcmask 257024  }
  0x14   :  { %v88_v1 = vunpack.c.l.bf16 %v87_v0  ;;  %v89_v2 = vunpack.c.h.bf16 %v87_v0  ;;  %v48_v15 = vld [vmem:[%s199_s1] sm:$0x1]  ;;  %s72_s25 = sshll.u32 %s149_s24, 4  ;;  %s73_s25 = int_to_ptr.vmem [resolvable:$true] %s72_s25 }
  0x15   :  { %v53_v14 = vshrl.u32 %v52_v13, 7  ;;  %v50_v16 = vpack.i.b16 %v48_v15, %v48_v15  ;;  %s120_s26 = scalar_lea.vmem %s73_s25, 128  ;;  %p125_p9 = scmp.lt.s32.totalorder %s73_s25, %s73_s25 }
  0x16   :  { %v30_v3 = vmul.f32 %v88_v1, %v88_v1  ;;  %v31_v4 = vmul.f32 %v89_v2, %v89_v2  ;;  %p121_p8 = scmp.ne.s32.totalorder %s73_s25, %s120_s26  ;;  %p126_p10 = scmp.lt.s32.totalorder %s120_s26, %s120_s26 }
  0x17   :  { %v54_v17 = vsub.s32 0, %v53_v14 }
  0x18   :  { %v33_v5 = vsel %vm32_vm0, %v30_v3, 0.0  ;;  %v36_v6 = vsel %vm32_vm0, %v31_v4, 0.0  ;;  %p127_p11 = por %p126_p10, %p125_p9 }
  0x19   :  { %34 = vadd.xlane.f32.xlu0 %v33_v5  ;;  %v55_v22 = vrot.slane %v50_v16, %v54_v17 }
  0x1a   :  { %p128_p12 = pnand %p127_p11, %p121_p8 }
  0x1d   :  { %37 = vadd.xlane.f32.xlu0 %v36_v6 }
  0xa6   :  { %v35_v7 = vpop.xlane.xlu0 %34 }
  0xa7   :  { %v39_v8 = vmul.f32 0.03125, %v35_v7 }
  0xa9   :  { %v41_v9 = vadd.f32 1e-06, %v39_v8 }
  0xaa   :  { %v38_v10 = vpop.xlane.xlu0 %37 }
  0xab   :  { %v40_v11 = vmul.f32 0.03125, %v38_v10  ;;  %94 = vrsqrt.f32 %v41_v9 }
  0xad   :  { %v42_v12 = vadd.f32 1e-06, %v40_v11 }
  0xaf   :  { %96 = vrsqrt.f32 %v42_v12 }
  0xb5   :  { %v95_v18 = vpop.eup %94 }
  0xb6   :  { %v45_v20 = vmul.f32 %v95_v18, %v88_v1 }
  0xb9   :  { %v97_v19 = vpop.eup %96 }
  0xba   :  { %v46_v21 = vmul.f32 %v97_v19, %v89_v2 }
  0xbc   :  { %v47_v23 = vpack.c.bf16 %v46_v21, %v45_v20 }
  0xbe   :  { %v56_v24 = vmul.bf16 %v55_v22, %v47_v23 }
  0xc0   :  { %v84_v25 = vcombine.low %v56_v24, %v56_v24  ;;  %v85_v26 = vcombine.high %v56_v24, %v56_v24 }
  0xc2   :  { %65 = vst.msk [vmem:[#allocation5] sm:$0xf] %vm64_vm1, %v84_v25  ;;  %66 = vst.msk [vmem:[#allocation5 + $0x4] sm:$0xf] %vm64_vm1, %v85_v26 }
  0xc3   :  { %131 = shalt.err (!%p128_p12)
}
  0xc4   :  { %s132_s28 = scalar_lea.hbm %s200_s2, 128 }
  0xc5   :  { %p133_p13 = scmp.ne.s32.totalorder %s200_s2, %s132_s28  ;;  %p136_p0 = scmp.lt.u32.totalorder %s132_s28, %s200_s2 }
  0xc7   :  { %p138_p1 = pnand %p136_p0, %p133_p13 }
  0xc9   :  { %141 = shalt.err (!%p138_p1)
}
  0xca   :  { %78 = dma.vmem_to_hbm [thread:$0]  %s73_s25, 128, %s200_s2, [#allocation4], %s147_s19, %s147_s19, %s148_s20  }
  0xcb   :  { %144 = dma.done.wait [#allocation4], 128  }
  0xcc   :  { %145 = vsyncadd [#allocation4], 4294967168 }
  0xcd   :  { %82 = vsyncpa [#allocation3], 1 }
  0xce   :  { %83 = vsyncpa [#allocation4], 1 }

</bundles_post_ra>
